<compile_context>
chip_gen: v7x
topology: tpu7x:2x2x1
jax: 0.10.0
libtpu: 0.0.40
codegen_flags: <defaults>
</compile_context>

<pallas_src>
import math
import functools

import jax
import jax.numpy as jnp
from jax.experimental import pallas as pl
from jax.experimental.pallas import tpu as pltpu


class SequenceTooLongError(Exception):
    pass


# -----------------------------------------------------------------------------
# Buffer init (matches the PyTorch __init__; host-side, not part of the kernel).
# -----------------------------------------------------------------------------
def make_sinusoidal_interleaved_pe(max_len: int, dim: int) -> jnp.ndarray:
    if dim % 2 != 0:
        raise ValueError(f"Cannot use sin/cos positional encoding with odd dim (got dim={dim})")
    position = jnp.arange(0, max_len, dtype=jnp.float32)[:, None]            # (max_len, 1)
    div_term = jnp.exp(jnp.arange(0, dim, 2, dtype=jnp.float32) * -(math.log(10000.0) / dim))
    sin = jnp.sin(position * div_term)                                        # (max_len, dim/2)
    cos = jnp.cos(position * div_term)                                        # (max_len, dim/2)
    # interleave: pe[:, 0::2] = sin, pe[:, 1::2] = cos
    return jnp.stack([sin, cos], axis=-1).reshape(max_len, dim)


def make_sinusoidal_concat_pe(max_len: int, dim: int) -> jnp.ndarray:
    if dim % 2 != 0:
        raise ValueError(f"Cannot use sin/cos positional encoding with odd dim (got dim={dim})")
    half_dim = dim // 2
    s = math.log(10000.0) / (half_dim - 1)
    inv_freq = jnp.exp(jnp.arange(half_dim, dtype=jnp.float32) * -s)
    ang = jnp.arange(max_len, dtype=jnp.float32)[:, None] * inv_freq[None, :]
    return jnp.concatenate([jnp.sin(ang), jnp.cos(ang)], axis=1).reshape(max_len, dim)


# -----------------------------------------------------------------------------
# Kernel: single elementwise body shared by all tiling layouts.
# -----------------------------------------------------------------------------
def _pe_add_kernel(emb_ref, pe_ref, out_ref, *, scale):
    # Layouts used:
    #   flat:            emb (B, Lt)     + pe (1, Lt)    (sublane broadcast)
    #   batch-folded:    emb (B, TS, D)  + pe (TS, D)    (leading-dim broadcast)
    #   batch-squeezed:  emb (TS, D)     + pe (TS, D)    (no broadcast)
    out_ref[...] = emb_ref[...] * scale + pe_ref[...]


_SUBLANE = {4: 8, 2: 16, 1: 32}     # min sublane multiple per itemsize (f32 / bf16 / int8)


def _seq_tile(S, row_bytes, sub, tile_bytes):
    """Sequence-tile size: multiple of `sub`, ~tile_bytes worth of rows, never above S."""
    if S <= sub:
        return S                              # full-dim block is always legal
    ts = (tile_bytes // max(row_bytes, 1)) // sub * sub
    ts = max(sub, ts)
    return min(ts, (S // sub) * sub)          # remainder handled by edge-block padding


# -----------------------------------------------------------------------------
# Wrapper (forward of PositionalEncoding).
# -----------------------------------------------------------------------------
def positional_encoding(emb, pe, dim, step=None, *, tile_bytes=2 * 1024 * 1024):
    """emb: (B, S, D); pe: (max_len, D). Returns emb * sqrt(dim) + pe[step:step+S]."""
    step = 0 if step is None else int(step)   # static Python int, same as the torch module
    B, S, D = emb.shape
    max_len = pe.shape[0]
    if max_len < step + S:
        raise SequenceTooLongError(
            f"Sequence is {S + step} but PositionalEncoding is limited to {max_len}. "
            "See max_len argument."
        )

    scale = math.sqrt(dim)
    itemsize = jnp.dtype(emb.dtype).itemsize
    sub = _SUBLANE.get(itemsize, 8)
    # TODO(synk): for decode loops where `step` changes every call, feed `step` via
    # scalar prefetch (num_scalar_prefetch=1) instead of a static slice to avoid a
    # recompile per step value.
    pe_slice = jax.lax.slice(pe, (step, 0), (step + S, D)).astype(emb.dtype)  # (S, D)
    kernel = functools.partial(_pe_add_kernel, scale=scale)

    if D % 128 != 0:
        # ---- lane-dense path: flatten (S, D) so the output last dim is a large
        # multiple of 128 (D < 128 would force masked partial-lane stores). The
        # (B, S, D)->(B, S*D) reshape merges contiguous trailing dims, so it is a
        # free (no-copy) layout change in XLA on both sides of the call. ----
        L = S * D
        emb2 = emb.reshape(B, L)
        pe2 = pe_slice.reshape(1, L)
        if L >= 256:
            # Tile the flattened axis in multiples of 128. A non-multiple remainder
            # just becomes one padded edge block (only that tile gets masked stores),
            # and no single block can exceed the VMEM budget for large shapes.
            lt = max(128, (tile_bytes // max(B * itemsize, 1)) // 128 * 128)
            lt = min(lt, (L // 128) * 128)
        else:
            lt = L                            # tiny shapes: single full block
        out2 = pl.pallas_call(
            kernel,
            out_shape=jax.ShapeDtypeStruct((B, L), emb.dtype),
            grid_spec=pltpu.PrefetchScalarGridSpec(
                num_scalar_prefetch=0,
                grid=(pl.cdiv(L, lt),),
                in_specs=[
                    pl.BlockSpec((B, lt), lambda i: (0, i)),
                    pl.BlockSpec((1, lt), lambda i: (0, i)),
                ],
                out_specs=pl.BlockSpec((B, lt), lambda i: (0, i)),
            ),
            compiler_params=pltpu.CompilerParams(dimension_semantics=("parallel",)),
        )(emb2, pe2)
        return out2.reshape(B, S, D)

    # ---- D is lane-aligned: tile the sequence axis. ----
    min_rows = S if S <= sub else sub
    fold_batch = B * min_rows * D * itemsize <= tile_bytes

    if fold_batch:
        # One grid axis over S-tiles; batch folded into the block so each pe tile is
        # DMA'd exactly once and per-step overhead is paid once per S-tile.
        ts = _seq_tile(S, B * D * itemsize, sub, tile_bytes)
        return pl.pallas_call(
            kernel,
            out_shape=jax.ShapeDtypeStruct((B, S, D), emb.dtype),
            grid_spec=pltpu.PrefetchScalarGridSpec(
                num_scalar_prefetch=0,
                grid=(pl.cdiv(S, ts),),
                in_specs=[
                    pl.BlockSpec((B, ts, D), lambda s: (0, s, 0)),
                    pl.BlockSpec((ts, D), lambda s: (s, 0)),
                ],
                out_specs=pl.BlockSpec((B, ts, D), lambda s: (0, s, 0)),
            ),
            compiler_params=pltpu.CompilerParams(dimension_semantics=("parallel",)),
        )(emb, pe_slice)

    # Batch too large to fold: grid=(S_tiles, B). Batch is the inner axis so the pe
    # block index is constant across consecutive steps (re-fetch elided); batch dim is
    # squeezed so the kernel is a plain rank-2 add with no broadcast.
    ts = _seq_tile(S, D * itemsize, sub, tile_bytes)
    return pl.pallas_call(
        kernel,
        out_shape=jax.ShapeDtypeStruct((B, S, D), emb.dtype),
        grid_spec=pltpu.PrefetchScalarGridSpec(
            num_scalar_prefetch=0,
            grid=(pl.cdiv(S, ts), B),
            in_specs=[
                pl.BlockSpec((pl.Squeezed(), ts, D), lambda s, b: (b, s, 0)),
                pl.BlockSpec((ts, D), lambda s, b: (s, 0)),
            ],
            out_specs=pl.BlockSpec((pl.Squeezed(), ts, D), lambda s, b: (b, s, 0)),
        ),
        compiler_params=pltpu.CompilerParams(dimension_semantics=("parallel", "parallel")),
    )(emb, pe_slice)


if __name__ == "__main__":
    key = jax.random.PRNGKey(0)
    k1, k2, k3 = jax.random.split(key, 3)

    # Case 1: D < 128 (the module's small test shape) -> flattened lane-dense path.
    B, S, D, max_len = 2, 8, 32, 64
    emb = jax.random.normal(k1, (B, S, D), dtype=jnp.float32)
    pe = make_sinusoidal_interleaved_pe(max_len, D)
    out = jax.block_until_ready(positional_encoding(emb, pe, D, step=0))
    ref = emb * math.sqrt(D) + pe[None, 0:S, :]
    assert out.shape == (B, S, D)
    assert jnp.allclose(out, ref, atol=1e-5, rtol=1e-5), "mismatch (flat path)"

    # Case 2: lane-aligned D with a nonzero step -> batch-folded 3-D tiled path.
    B2, S2, D2, max_len2, step2 = 2, 16, 128, 64, 3
    emb2 = jax.random.normal(k2, (B2, S2, D2), dtype=jnp.float32)
    pe2 = make_sinusoidal_interleaved_pe(max_len2, D2)
    out2 = jax.block_until_ready(positional_encoding(emb2, pe2, D2, step=step2))
    ref2 = emb2 * math.sqrt(D2) + pe2[None, step2:step2 + S2, :]
    assert jnp.allclose(out2, ref2, atol=1e-5, rtol=1e-5), "mismatch (fold path)"

    # Case 3: force the non-folded (S_tiles, B) squeezed-batch path with a tiny tile budget.
    step3 = 5
    out3 = jax.block_until_ready(positional_encoding(emb2, pe2, D2, step=step3, tile_bytes=4096))
    ref3 = emb2 * math.sqrt(D2) + pe2[None, step3:step3 + S2, :]
    assert jnp.allclose(out3, ref3, atol=1e-5, rtol=1e-5), "mismatch (squeezed path)"

    # Case 4: flat path where S*D is NOT a multiple of 128 -> tiled with a padded edge block
    # (SinusoidalConcat table variant, tiny tile budget to force multiple grid steps).
    B4, S4, D4, max_len4 = 2, 40, 24, 64
    emb4 = jax.random.normal(k3, (B4, S4, D4), dtype=jnp.float32)
    pe4 = make_sinusoidal_concat_pe(max_len4, D4)
    out4 = jax.block_until_ready(positional_encoding(emb4, pe4, D4, step=2, tile_bytes=4096))
    ref4 = emb4 * math.sqrt(D4) + pe4[None, 2:2 + S4, :]
    assert jnp.allclose(out4, ref4, atol=1e-5, rtol=1e-5), "mismatch (flat edge-block path)"

    print("KERNEL_OK")
</pallas_src>

<mosaic_0001>
module attributes {stable_mosaic.version = 11 : i64} {
  func.func @_pe_add_kernel(%arg0: i32, %arg1: memref<2x256xf32, #tpu.memory_space<vmem>>, %arg2: memref<1x256xf32, #tpu.memory_space<vmem>>, %arg3: memref<2x256xf32, #tpu.memory_space<vmem>>) attributes {dimension_semantics = [#tpu.dimension_semantics<parallel>], iteration_bounds = array<i64: 1>, scalar_prefetch = 0 : i64, scratch_operands = 0 : i64, tpu.core_type = #tpu.core_type<tc>, window_params = [{transform_indices = @transform_0, window_bounds = array<i64: 2, 256>}, {transform_indices = @transform_1, window_bounds = array<i64: 1, 256>}, {transform_indices = @transform_2, window_bounds = array<i64: 2, 256>}]} {
    %c0 = arith.constant 0 : index
    %c0_0 = arith.constant 0 : index
    %0 = vector.load %arg1[%c0, %c0_0] : memref<2x256xf32, #tpu.memory_space<vmem>>, vector<2x256xf32>
    %cst = arith.constant 5.65685415 : f32
    %1 = vector.broadcast %cst : f32 to vector<2x256xf32>
    %2 = arith.mulf %0, %1 : vector<2x256xf32>
    %c0_1 = arith.constant 0 : index
    %c0_2 = arith.constant 0 : index
    %3 = vector.load %arg2[%c0_1, %c0_2] : memref<1x256xf32, #tpu.memory_space<vmem>>, vector<1x256xf32>
    %4 = vector.broadcast %3 : vector<1x256xf32> to vector<2x256xf32>
    %5 = arith.addf %2, %4 : vector<2x256xf32>
    %c0_3 = arith.constant 0 : index
    %c0_4 = arith.constant 0 : index
    %6 = vector.load %arg3[%c0_3, %c0_4] : memref<2x256xf32, #tpu.memory_space<vmem>>, vector<2x256xf32>
    tpu.vector_store %arg3[%c0_3, %c0_4], %5 {strides = array<i32>} : memref<2x256xf32, #tpu.memory_space<vmem>>, vector<2x256xf32>,
    return
  }
  func.func @transform_0(%arg0: i32) -> (i32, i32) {
    %c0_i32 = arith.constant 0 : i32
    %c0_i32_0 = arith.constant 0 : i32
    return %c0_i32, %arg0 : i32, i32
  }
  func.func @transform_1(%arg0: i32) -> (i32, i32) {
    %c0_i32 = arith.constant 0 : i32
    %c0_i32_0 = arith.constant 0 : i32
    return %c0_i32, %arg0 : i32, i32
  }
  func.func @transform_2(%arg0: i32) -> (i32, i32) {
    %c0_i32 = arith.constant 0 : i32
    %c0_i32_0 = arith.constant 0 : i32
    return %c0_i32, %arg0 : i32, i32
  }
}

</mosaic_0001>

<bundles_post_ra>
// kernel: tpu_custom_call.1
= control target key start
LH: loop header
LB: loop body
LE: loop exit
PB: predicated region body
PF: predicated region fallthrough
CT: control target
= control target key end

     0   :  { %7 = vsyncpa [#allocation3], 0  ;;  %s158_s0 = inlined_call_operand.hbm [shape: f32[2,256], index: 0, kind: input, shape index: {}]   ;;  %s159_s1 = inlined_call_operand.vmem [shape: f32[1,256], index: 1, kind: input, shape index: {}]   ;;  %s160_s2 = inlined_call_operand.hbm [shape: f32[2,256], index: 2, kind: output, shape index: {}]  }
   0x1   :  { %8 = vsyncpa [#allocation4], 0  ;;  %s113_s9 = smov [#allocation2]   ;;  %s65_s13 = scalar_lea.hbm %s158_s0, 64 }
   0x2   :  { %s15_s10 = sshll.u32 %s113_s9, 4  ;;  %p66_p0 = scmp.ne.s32.totalorder %s158_s0, %s65_s13  ;;  %s16_s10 = int_to_ptr.vmem [resolvable:$true] %s15_s10 }
   0x3   :  { %p69_p1 = scmp.lt.u32.totalorder %s65_s13, %s158_s0 }
   0x5   :  { %p71_p2 = pnand %p69_p1, %p66_p0 }
   0x7   :  { %74 = shalt.err (!%p71_p2)
}
   0x8   :  { %s75_s18 = scalar_lea.vmem %s16_s10, 64  ;;  %p80_p4 = scmp.lt.s32.totalorder %s16_s10, %s16_s10 }
   0x9   :  { %p76_p3 = scmp.ne.s32.totalorder %s16_s10, %s75_s18  ;;  %p81_p5 = scmp.lt.s32.totalorder %s75_s18, %s75_s18 }
   0xb   :  { %p82_p6 = por %p81_p5, %p80_p4 }
   0xd   :  { %p83_p7 = pnand %p82_p6, %p76_p3 }
   0xf   :  { %86 = shalt.err (!%p83_p7)
}
  0x10   :  { %18 = dma.hbm_to_vmem [thread:$0]  %s158_s0, 64, %s16_s10, [#allocation3]  }
  0x11   :  { %109 = dma.done.wait [#allocation3], 64  }
  0x12   :  { %110 = vsyncadd [#allocation3], 4294967232  ;;  %v28_v0 = vlaneseq  ;;  %v114_v1 = vmov 1983009808   ;;  %v24_v7 = vld [vmem:[#allocation2] sm:$0xf] }
  0x13   :  { %v38_v2 = vunpack.c.l.s4 %v114_v1  ;;  %v26_v8 = vld [vmem:[%s159_s1] sm:$0x3]  ;;  %v25_v12 = vmul.f32 5.656854, %v24_v7  ;;  %s115_s0 = smov [#allocation5]  }
  0x14   :  { %v29_v3 = vshrl.u32 %v28_v0, 7  ;;  %s53_s23 = sshll.u32 %s115_s0, 4  ;;  %s54_s23 = int_to_ptr.vmem [resolvable:$true] %s53_s23 }
  0x15   :  { %v39_v6 = vunpack.c.0.s8 %v38_v2  ;;  %s87_s24 = scalar_lea.vmem %s54_s23, 64  ;;  %p92_p9 = scmp.lt.s32.totalorder %s54_s23, %s54_s23 }
  0x16   :  { %v30_v4 = vsub.s32 0, %v29_v3  ;;  %v34_v5 = vsub.s32 1, %v29_v3  ;;  %p88_p8 = scmp.ne.s32.totalorder %s54_s23, %s87_s24  ;;  %p93_p10 = scmp.lt.s32.totalorder %s87_s24, %s87_s24 }
  0x17   :  { %v42_v11 = vsub.s32 %v39_v6, %v29_v3 }
  0x18   :  { %v31_v9 = vrot.slane %v26_v8, %v30_v4  ;;  %v35_v10 = vrot.slane %v26_v8, %v34_v5  ;;  %p94_p11 = por %p93_p10, %p92_p9 }
  0x1a   :  { %v36_v13 = vcombine.low %v31_v9, %v35_v10  ;;  %p95_p12 = pnand %p94_p11, %p88_p8 }
  0x1c   :  { %v43_v14 = vrot.slane %v36_v13, %v42_v11 }
  0x1e   :  { %v45_v15 = vadd.f32 %v43_v14, %v25_v12 }
  0x20   :  { %46 = vst [vmem:[#allocation5] sm:$0xf] %v45_v15 }
  0x21   :  { %98 = shalt.err (!%p95_p12)
}
  0x22   :  { %s99_s26 = scalar_lea.hbm %s160_s2, 64 }
  0x23   :  { %p100_p13 = scmp.ne.s32.totalorder %s160_s2, %s99_s26  ;;  %p103_p0 = scmp.lt.u32.totalorder %s99_s26, %s160_s2 }
  0x25   :  { %p105_p1 = pnand %p103_p0, %p100_p13 }
  0x27   :  { %108 = shalt.err (!%p105_p1)
}
  0x28   :  { %56 = dma.vmem_to_hbm [thread:$0]  %s54_s23, 64, %s160_s2, [#allocation4]  }
  0x29   :  { %111 = dma.done.wait [#allocation4], 64  }
  0x2a   :  { %112 = vsyncadd [#allocation4], 4294967232 }
  0x2b   :  { %60 = vsyncpa [#allocation3], 1 }
  0x2c   :  { %61 = vsyncpa [#allocation4], 1 }

</bundles_post_ra>
